<compile_context>
chip_gen: v7x
topology: tpu7x:2x2x1
jax: 0.10.0
libtpu: 0.0.40
codegen_flags: <defaults>
</compile_context>

<pallas_src>
from functools import partial

import jax
import jax.numpy as jnp
from jax import lax
from jax.experimental import pallas as pl
from jax.experimental.pallas import tpu as pltpu

RES_SCALE = 0.1


def res_block_kernel(xe_ref, mask_ref, w1_ref, b1_ref, w2_ref, b2_ref, o_ref,
                     *, H, W, C, res_scale, compute_dtype):
    # xe_ref  : (C, Le) f32  zero-padded image, flattened, zero-extended by
    #                        `ext` on each side (Le = Lp + 2*ext)
    # mask_ref: (1, Lp) f32  1.0 on interior pixels of the padded-flat grid
    # w1/w2   : (C, 9C)      im2col weights (tap-major), compute_dtype
    # b1/b2   : (C, 1)  f32
    # o_ref   : (C, Lp) f32  output on the padded-flat grid (border = don't care)
    Wp = W + 2
    Lp = (H + 2) * Wp          # padded-grid flat length
    ext = W + 3                # zero extension on each side of the flat image
    taps = [di * Wp + dj for di in range(3) for dj in range(3)]

    xe = xe_ref[...]           # (C, Le) f32
    mask = mask_ref[...]       # (1, Lp) f32

    def conv3x3(src_ext, w_ref, b_ref):
        # src_ext: (C, Le).  Stack the 9 shifted taps -> (9C, Lp) im2col matrix,
        # then a single (C, 9C) @ (9C, Lp) MXU matmul with f32 accumulation.
        patches = jnp.concatenate([src_ext[:, t:t + Lp] for t in taps], axis=0)
        acc = jnp.dot(w_ref[...], patches.astype(compute_dtype),
                      preferred_element_type=jnp.float32)       # (C, Lp) f32
        return acc + b_ref[...]                                 # bias (C, 1)

    # ---- conv1 + ReLU; zero the padded-grid border so conv2 sees true zeros
    h1 = jnp.maximum(conv3x3(xe, w1_ref, b1_ref), 0.0) * mask   # (C, Lp) f32

    # ---- conv2 on the zero-extended intermediate
    zpad = jnp.zeros((C, ext), jnp.float32)
    h1e = jnp.concatenate([zpad, h1, zpad], axis=1)             # (C, Le) f32
    h2 = conv3x3(h1e, w2_ref, b2_ref)                           # (C, Lp) f32

    # ---- residual: x + m(x) * res_scale.  Border positions of the padded-flat
    # grid are discarded by the wrapper's interior slice, so they can hold
    # anything; only the interior must be exact.
    x_flat = xe[:, ext:ext + Lp]                                # (C, Lp) f32
    o_ref[...] = x_flat + res_scale * h2


def res_sequential(x_nchw, w1, b1, w2, b2, res_scale=RES_SCALE,
                   compute_dtype=jnp.bfloat16):
    """x_nchw: (N, C, H, W).  w1/w2: (C, C, 3, 3) torch OIHW.  b1/b2: (C,)."""
    N, C, H, W = x_nchw.shape
    Hp, Wp = H + 2, W + 2
    Lp = Hp * Wp
    ext = W + 3
    Le = Lp + 2 * ext

    x = x_nchw.astype(jnp.float32)
    # Zero-pad spatially, flatten the padded grid, and add `ext` zeros on each
    # side so every 3x3 tap is a static, in-bounds lane-slice in the kernel.
    xp = jnp.pad(x, ((0, 0), (0, 0), (1, 1), (1, 1)))           # (N, C, Hp, Wp)
    xe = jnp.pad(xp.reshape(N, C, Lp), ((0, 0), (0, 0), (ext, ext)))

    # 1.0 on interior pixels of the padded-flat grid, 0.0 on the 1-px border.
    mask = (jnp.zeros((Hp, Wp), jnp.float32)
            .at[1:H + 1, 1:W + 1].set(1.0)).reshape(1, Lp)

    # torch (Cout, Cin, 3, 3) -> (Cout, 3, 3, Cin) -> (Cout, 9*Cin), tap-major,
    # matching the kernel's patch stacking order (di outer, dj inner).
    w1_k = jnp.transpose(w1, (0, 2, 3, 1)).reshape(C, 9 * C).astype(compute_dtype)
    w2_k = jnp.transpose(w2, (0, 2, 3, 1)).reshape(C, 9 * C).astype(compute_dtype)
    b1_k = b1.reshape(C, 1).astype(jnp.float32)
    b2_k = b2.reshape(C, 1).astype(jnp.float32)

    kernel = partial(res_block_kernel, H=H, W=W, C=C,
                     res_scale=res_scale, compute_dtype=compute_dtype)

    # TODO(synk): for real EDSR sizes (C=64+, large H*W) tile the grid over
    # rows of H with a 1-row halo and set vmem_limit_bytes (v7x has 64 MiB VMEM)
    # so the grid is long enough to pipeline and to split across 2 TensorCores.
    out_flat = pl.pallas_call(
        kernel,
        out_shape=jax.ShapeDtypeStruct((N, C, Lp), jnp.float32),
        grid_spec=pltpu.PrefetchScalarGridSpec(
            num_scalar_prefetch=0,
            grid=(N,),
            in_specs=[
                pl.BlockSpec((None, C, Le), lambda n: (n, 0, 0)),   # xe
                pl.BlockSpec((1, Lp), lambda n: (0, 0)),            # mask
                pl.BlockSpec((C, 9 * C), lambda n: (0, 0)),         # w1
                pl.BlockSpec((C, 1), lambda n: (0, 0)),             # b1
                pl.BlockSpec((C, 9 * C), lambda n: (0, 0)),         # w2
                pl.BlockSpec((C, 1), lambda n: (0, 0)),             # b2
            ],
            out_specs=pl.BlockSpec((None, C, Lp), lambda n: (n, 0, 0)),
        ),
        compiler_params=pltpu.CompilerParams(
            dimension_semantics=("parallel",)),
    )(xe, mask, w1_k, b1_k, w2_k, b2_k)

    # Drop the 1-px border of the padded-flat output -> (N, C, H, W).
    return out_flat.reshape(N, C, Hp, Wp)[:, :, 1:H + 1, 1:W + 1]


def ref_forward(x, w1, b1, w2, b2, res_scale=RES_SCALE,
                compute_dtype=jnp.float32):
    """Pure-JAX reference of ResSequential([conv3x3, ReLU, conv3x3], scale).

    `compute_dtype` controls the conv operand dtype (accumulation stays f32),
    so we can check the kernel's bf16-operand MXU path tightly.
    """
    def conv(h, w, b):
        y = lax.conv_general_dilated(
            h.astype(compute_dtype), w.astype(compute_dtype),
            window_strides=(1, 1), padding="SAME",
            dimension_numbers=("NCHW", "OIHW", "NCHW"),
            preferred_element_type=jnp.float32)
        return y + b.reshape(1, -1, 1, 1).astype(jnp.float32)

    h = jnp.maximum(conv(x, w1, b1), 0.0)
    h = conv(h, w2, b2)
    return x.astype(jnp.float32) + res_scale * h


if __name__ == "__main__":
    # small shapes consistent with the module: NCHW input, C->C 3x3 convs
    N, C, H, W = 2, 8, 16, 16
    key = jax.random.PRNGKey(0)
    kx, kw1, kb1, kw2, kb2 = jax.random.split(key, 5)

    x = jax.random.normal(kx, (N, C, H, W), jnp.float32)
    fan_in = C * 3 * 3
    w1 = jax.random.normal(kw1, (C, C, 3, 3), jnp.float32) / jnp.sqrt(fan_in)
    b1 = jax.random.normal(kb1, (C,), jnp.float32) * 0.01
    w2 = jax.random.normal(kw2, (C, C, 3, 3), jnp.float32) / jnp.sqrt(fan_in)
    b2 = jax.random.normal(kb2, (C,), jnp.float32) * 0.01

    out = jax.block_until_ready(res_sequential(x, w1, b1, w2, b2))
    assert out.shape == (N, C, H, W)

    # Tight check against a reference that uses the same bf16 matmul operands
    # with f32 accumulation (mirrors the kernel's MXU path).
    ref_bf16 = ref_forward(x, w1, b1, w2, b2, compute_dtype=jnp.bfloat16)
    assert jnp.allclose(out, ref_bf16, atol=5e-3, rtol=5e-3), \
        "mismatch vs bf16-operand reference"

    # Semantic check against the full-f32 module forward (bf16 rounding tol).
    ref_f32 = ref_forward(x, w1, b1, w2, b2, compute_dtype=jnp.float32)
    assert jnp.allclose(out, ref_f32, atol=3e-2, rtol=3e-2), \
        "mismatch vs f32 reference"

    print("KERNEL_OK")
</pallas_src>

<mosaic_0001>
module attributes {stable_mosaic.version = 11 : i64} {
  func.func @res_block_kernel(%arg0: i32, %arg1: memref<1x8x362xf32, #tpu.memory_space<vmem>>, %arg2: memref<1x324xf32, #tpu.memory_space<vmem>>, %arg3: memref<8x72xbf16, #tpu.memory_space<vmem>>, %arg4: memref<8x1xf32, #tpu.memory_space<vmem>>, %arg5: memref<8x72xbf16, #tpu.memory_space<vmem>>, %arg6: memref<8x1xf32, #tpu.memory_space<vmem>>, %arg7: memref<1x8x324xf32, #tpu.memory_space<vmem>>) attributes {dimension_semantics = [#tpu.dimension_semantics<parallel>], iteration_bounds = array<i64: 2>, scalar_prefetch = 0 : i64, scratch_operands = 0 : i64, tpu.core_type = #tpu.core_type<tc>, window_params = [{transform_indices = @transform_0, window_bounds = array<i64: 1, 8, 362>}, {pipeline_mode = #tpu.pipeline_mode<synchronous>, transform_indices = @transform_1, window_bounds = array<i64: 1, 324>}, {pipeline_mode = #tpu.pipeline_mode<synchronous>, transform_indices = @transform_2, window_bounds = array<i64: 8, 72>}, {pipeline_mode = #tpu.pipeline_mode<synchronous>, transform_indices = @transform_3, window_bounds = array<i64: 8, 1>}, {pipeline_mode = #tpu.pipeline_mode<synchronous>, transform_indices = @transform_4, window_bounds = array<i64: 8, 72>}, {pipeline_mode = #tpu.pipeline_mode<synchronous>, transform_indices = @transform_5, window_bounds = array<i64: 8, 1>}, {transform_indices = @transform_6, window_bounds = array<i64: 1, 8, 324>}]} {
    %c0 = arith.constant 0 : index
    %c0_0 = arith.constant 0 : index
    %c0_1 = arith.constant 0 : index
    %0 = vector.load %arg1[%c0, %c0_0, %c0_1] : memref<1x8x362xf32, #tpu.memory_space<vmem>>, vector<1x8x362xf32>
    %1 = vector.shape_cast %0 : vector<1x8x362xf32> to vector<8x362xf32>
    %c0_2 = arith.constant 0 : index
    %c0_3 = arith.constant 0 : index
    %2 = vector.load %arg2[%c0_2, %c0_3] : memref<1x324xf32, #tpu.memory_space<vmem>>, vector<1x324xf32>
    %3 = vector.extract_strided_slice %1 {offsets = [0, 0], sizes = [8, 324], strides = [1, 1]} : vector<8x362xf32> to vector<8x324xf32>
    %4 = vector.extract_strided_slice %1 {offsets = [0, 1], sizes = [8, 324], strides = [1, 1]} : vector<8x362xf32> to vector<8x324xf32>
    %5 = vector.extract_strided_slice %1 {offsets = [0, 2], sizes = [8, 324], strides = [1, 1]} : vector<8x362xf32> to vector<8x324xf32>
    %6 = vector.extract_strided_slice %1 {offsets = [0, 18], sizes = [8, 324], strides = [1, 1]} : vector<8x362xf32> to vector<8x324xf32>
    %7 = vector.extract_strided_slice %1 {offsets = [0, 19], sizes = [8, 324], strides = [1, 1]} : vector<8x362xf32> to vector<8x324xf32>
    %8 = vector.extract_strided_slice %1 {offsets = [0, 20], sizes = [8, 324], strides = [1, 1]} : vector<8x362xf32> to vector<8x324xf32>
    %9 = vector.extract_strided_slice %1 {offsets = [0, 36], sizes = [8, 324], strides = [1, 1]} : vector<8x362xf32> to vector<8x324xf32>
    %10 = vector.extract_strided_slice %1 {offsets = [0, 37], sizes = [8, 324], strides = [1, 1]} : vector<8x362xf32> to vector<8x324xf32>
    %11 = vector.extract_strided_slice %1 {offsets = [0, 38], sizes = [8, 324], strides = [1, 1]} : vector<8x362xf32> to vector<8x324xf32>
    %12 = tpu.concatenate %3, %4, %5, %6, %7, %8, %9, %10, %11 in 0 : vector<8x324xf32>, vector<8x324xf32>, vector<8x324xf32>, vector<8x324xf32>, vector<8x324xf32>, vector<8x324xf32>, vector<8x324xf32>, vector<8x324xf32>, vector<8x324xf32> -> vector<72x324xf32>
    %c0_4 = arith.constant 0 : index
    %c0_5 = arith.constant 0 : index
    %13 = vector.load %arg3[%c0_4, %c0_5] : memref<8x72xbf16, #tpu.memory_space<vmem>>, vector<8x72xbf16>
    %14 = arith.truncf %12 : vector<72x324xf32> to vector<72x324xbf16>
    %cst = arith.constant dense<0.000000e+00> : vector<8x324xf32>
    %15 = tpu.matmul %13, %14, %cst {dimension_numbers = #tpu.dot_dimension_numbers<[1], [0], [0], [1], [0, 0, 1, 1], [], []>} : vector<8x72xbf16>, vector<72x324xbf16>, vector<8x324xf32> -> vector<8x324xf32>
    %c0_6 = arith.constant 0 : index
    %c0_7 = arith.constant 0 : index
    %16 = vector.load %arg4[%c0_6, %c0_7] : memref<8x1xf32, #tpu.memory_space<vmem>>, vector<8x1xf32>
    %17 = vector.broadcast %16 : vector<8x1xf32> to vector<8x324xf32>
    %18 = arith.addf %15, %17 : vector<8x324xf32>
    %cst_8 = arith.constant 0.000000e+00 : f32
    %19 = vector.broadcast %cst_8 : f32 to vector<8x324xf32>
    %20 = arith.maximumf %18, %19 : vector<8x324xf32>
    %21 = vector.broadcast %2 : vector<1x324xf32> to vector<8x324xf32>
    %22 = arith.mulf %20, %21 : vector<8x324xf32>
    %cst_9 = arith.constant 0.000000e+00 : f32
    %23 = vector.broadcast %cst_9 : f32 to vector<8x19xf32>
    %24 = tpu.concatenate %23, %22, %23 in 1 : vector<8x19xf32>, vector<8x324xf32>, vector<8x19xf32> -> vector<8x362xf32>
    %25 = vector.extract_strided_slice %24 {offsets = [0, 0], sizes = [8, 324], strides = [1, 1]} : vector<8x362xf32> to vector<8x324xf32>
    %26 = vector.extract_strided_slice %24 {offsets = [0, 1], sizes = [8, 324], strides = [1, 1]} : vector<8x362xf32> to vector<8x324xf32>
    %27 = vector.extract_strided_slice %24 {offsets = [0, 2], sizes = [8, 324], strides = [1, 1]} : vector<8x362xf32> to vector<8x324xf32>
    %28 = vector.extract_strided_slice %24 {offsets = [0, 18], sizes = [8, 324], strides = [1, 1]} : vector<8x362xf32> to vector<8x324xf32>
    %29 = vector.extract_strided_slice %24 {offsets = [0, 19], sizes = [8, 324], strides = [1, 1]} : vector<8x362xf32> to vector<8x324xf32>
    %30 = vector.extract_strided_slice %24 {offsets = [0, 20], sizes = [8, 324], strides = [1, 1]} : vector<8x362xf32> to vector<8x324xf32>
    %31 = vector.extract_strided_slice %24 {offsets = [0, 36], sizes = [8, 324], strides = [1, 1]} : vector<8x362xf32> to vector<8x324xf32>
    %32 = vector.extract_strided_slice %24 {offsets = [0, 37], sizes = [8, 324], strides = [1, 1]} : vector<8x362xf32> to vector<8x324xf32>
    %33 = vector.extract_strided_slice %24 {offsets = [0, 38], sizes = [8, 324], strides = [1, 1]} : vector<8x362xf32> to vector<8x324xf32>
    %34 = tpu.concatenate %25, %26, %27, %28, %29, %30, %31, %32, %33 in 0 : vector<8x324xf32>, vector<8x324xf32>, vector<8x324xf32>, vector<8x324xf32>, vector<8x324xf32>, vector<8x324xf32>, vector<8x324xf32>, vector<8x324xf32>, vector<8x324xf32> -> vector<72x324xf32>
    %c0_10 = arith.constant 0 : index
    %c0_11 = arith.constant 0 : index
    %35 = vector.load %arg5[%c0_10, %c0_11] : memref<8x72xbf16, #tpu.memory_space<vmem>>, vector<8x72xbf16>
    %36 = arith.truncf %34 : vector<72x324xf32> to vector<72x324xbf16>
    %cst_12 = arith.constant dense<0.000000e+00> : vector<8x324xf32>
    %37 = tpu.matmul %35, %36, %cst_12 {dimension_numbers = #tpu.dot_dimension_numbers<[1], [0], [0], [1], [0, 0, 1, 1], [], []>} : vector<8x72xbf16>, vector<72x324xbf16>, vector<8x324xf32> -> vector<8x324xf32>
    %c0_13 = arith.constant 0 : index
    %c0_14 = arith.constant 0 : index
    %38 = vector.load %arg6[%c0_13, %c0_14] : memref<8x1xf32, #tpu.memory_space<vmem>>, vector<8x1xf32>
    %39 = vector.broadcast %38 : vector<8x1xf32> to vector<8x324xf32>
    %40 = arith.addf %37, %39 : vector<8x324xf32>
    %41 = vector.extract_strided_slice %1 {offsets = [0, 19], sizes = [8, 324], strides = [1, 1]} : vector<8x362xf32> to vector<8x324xf32>
    %cst_15 = arith.constant 1.000000e-01 : f32
    %42 = vector.broadcast %cst_15 : f32 to vector<8x324xf32>
    %43 = arith.mulf %42, %40 : vector<8x324xf32>
    %44 = arith.addf %41, %43 : vector<8x324xf32>
    %c0_16 = arith.constant 0 : index
    %c0_17 = arith.constant 0 : index
    %c0_18 = arith.constant 0 : index
    %45 = vector.load %arg7[%c0_16, %c0_17, %c0_18] : memref<1x8x324xf32, #tpu.memory_space<vmem>>, vector<1x8x324xf32>
    %46 = vector.shape_cast %45 : vector<1x8x324xf32> to vector<8x324xf32>
    %47 = vector.shape_cast %44 : vector<8x324xf32> to vector<1x8x324xf32>
    tpu.vector_store %arg7[%c0_16, %c0_17, %c0_18], %47 {strides = array<i32>} : memref<1x8x324xf32, #tpu.memory_space<vmem>>, vector<1x8x324xf32>,
    return
  }
  func.func @transform_0(%arg0: i32) -> (i32, i32, i32) {
    %c0_i32 = arith.constant 0 : i32
    %c0_i32_0 = arith.constant 0 : i32
    %c0_i32_1 = arith.constant 0 : i32
    return %arg0, %c0_i32, %c0_i32_0 : i32, i32, i32
  }
  func.func @transform_1(%arg0: i32) -> (i32, i32) {
    %c0_i32 = arith.constant 0 : i32
    %c0_i32_0 = arith.constant 0 : i32
    %c0_i32_1 = arith.constant 0 : i32
    return %c0_i32, %c0_i32_0 : i32, i32
  }
  func.func @transform_2(%arg0: i32) -> (i32, i32) {
    %c0_i32 = arith.constant 0 : i32
    %c0_i32_0 = arith.constant 0 : i32
    %c0_i32_1 = arith.constant 0 : i32
    return %c0_i32, %c0_i32_0 : i32, i32
  }
  func.func @transform_3(%arg0: i32) -> (i32, i32) {
    %c0_i32 = arith.constant 0 : i32
    %c0_i32_0 = arith.constant 0 : i32
    %c0_i32_1 = arith.constant 0 : i32
    return %c0_i32, %c0_i32_0 : i32, i32
  }
  func.func @transform_4(%arg0: i32) -> (i32, i32) {
    %c0_i32 = arith.constant 0 : i32
    %c0_i32_0 = arith.constant 0 : i32
    %c0_i32_1 = arith.constant 0 : i32
    return %c0_i32, %c0_i32_0 : i32, i32
  }
  func.func @transform_5(%arg0: i32) -> (i32, i32) {
    %c0_i32 = arith.constant 0 : i32
    %c0_i32_0 = arith.constant 0 : i32
    %c0_i32_1 = arith.constant 0 : i32
    return %c0_i32, %c0_i32_0 : i32, i32
  }
  func.func @transform_6(%arg0: i32) -> (i32, i32, i32) {
    %c0_i32 = arith.constant 0 : i32
    %c0_i32_0 = arith.constant 0 : i32
    %c0_i32_1 = arith.constant 0 : i32
    return %arg0, %c0_i32, %c0_i32_0 : i32, i32, i32
  }
}

</mosaic_0001>

<bundles_post_ra>
// kernel: tpu_custom_call.1
= control target key start
LH: loop header
LB: loop body
LE: loop exit
PB: predicated region body
PF: predicated region fallthrough
CT: control target
= control target key end

     0   :  { %11 = vsyncpa [#allocation3], 0  ;;  %s1522_s0 = inlined_call_operand.hbm [shape: f32[2,8,362], index: 0, kind: input, shape index: {}]   ;;  %s1523_s1 = inlined_call_operand.vmem [shape: f32[1,324], index: 1, kind: input, shape index: {}]   ;;  %s1524_s2 = inlined_call_operand.vmem [shape: bf16[8,72], index: 2, kind: input, shape index: {}]   ;;  %s1525_s3 = inlined_call_operand.vmem [shape: f32[8,1], index: 3, kind: input, shape index: {}]   ;;  %s1526_s4 = inlined_call_operand.vmem [shape: bf16[8,72], index: 4, kind: input, shape index: {}]   ;;  %s1527_s5 = inlined_call_operand.vmem [shape: f32[8,1], index: 5, kind: input, shape index: {}]   ;;  %s1528_s6 = inlined_call_operand.hbm [shape: f32[2,8,324], index: 6, kind: output, shape index: {}]  }
   0x1   :  { %13 = vsyncpa [#allocation3 + $0x1], 0 }
   0x2   :  { %14 = vsyncpa [#allocation4], 0 }
   0x3   :  { %16 = vsyncpa [#allocation4 + $0x1], 0  ;;  %s1215_s21 = smov 0   ;;  %s1217_s22 = smov 0  }
   0x4   :  { %s1219_s23 = smov 0   ;;  %s1221_s24 = smov 0  }
   0x5 LB: > { %s1236_s25 = sadd.s32 4294967295, %s1163_s24   ;;  %s857_s26 = sadd.s32 4294967294, %s1163_s24   ;;  %s1163_s24 = sphi %s1221_s24, %s1542_s24   ;;  %s1159_s23 = sphi %s1219_s23, %s1541_s23   ;;  %s1155_s22 = sphi %s1217_s22, %s1540_s22   ;;  %s1151_s21 = sphi %s1215_s21, %s1539_s21  }
   0x6   : > { %s1240_s27 = sadd.s32 1, %s1163_s24   ;;  %s29_s28 = sadd.s32 1, %s1159_s23 }
   0x7   : > { %s26_s29 = ssub.s32 %s1163_s24, %s1240_s27  ;;  %p36_p0 = scmp.ne.s32.totalorder %s1159_s23, %s1155_s22 }
   0x8   : > { %p27_p1 = scmp.eq.s32.totalorder %s26_s29, 0  ;;  %p37_p2 = scmp.eq.s32.totalorder %s1163_s24, 0 }
   0x9   : > { %p42_p3 = scmp.ne.s32.totalorder %s1155_s22, %s1151_s21  ;;  %p43_p4 = scmp.eq.s32.totalorder %s1236_s25, 0 }
   0xa   : > { %s1252_s30 = scalar_select %p27_p1, %s1159_s23, %s29_s28  }
   0xb   : > { %p38_p5 = por %p37_p2, %p36_p0  ;;  %p1254_p6 = por %p43_p4, %p42_p3 }
   0xc   : > { %p171_p7 = scmp.eq.s32.totalorder %s1236_s25, 1  ;;  %p177_p8 = scmp.eq.s32.totalorder %s857_s26, 1 }
   0xd   : > { %p934_p10 = scmp.lt.s32.totalorder %s1163_s24, 2  ;;  %s212_s10 = sand.u32 1, %s1159_s23  }
   0xe   : > { %p1261_p11 = por %p171_p7, %p36_p0  ;;  %p1265_p12 = por %p177_p8, %p42_p3 }
   0xf   : > { %s919_s11 = smul.u32 384, %s1163_s24  ;;  %p1276_p13 = pnand %p934_p10, %p38_p5 }
  0x10   : > { %s1531_s8 = scalar_select %p1261_p11, 1, 0 }
  0x11   : > { %s1532_s9 = scalar_select %p1265_p12, 1, 0 }
  0x12   : > { %s918_s12 = smul.u32 24, %s212_s10  ;;  %s1274_s15 = scalar_lea.hbm %s1522_s0, %s919_s11 }
  0x13   : > { %s213_s19 = scalar_lea.sflag [#allocation3], %s212_s10  ;;  %s1067_s20 = scalar_lea.hbm %s1274_s15, 384 }
  0x14   : > { %s216_s17 = scalar_lea.vmem [#allocation2], %s918_s12  ;;  %p1068_p2 = scmp.ne.s32.totalorder %s1274_s15, %s1067_s20 }
  0x15   : > { %s224_s18 = sshll.u32 %s216_s17, 4  ;;  %p1069_p3 = pneg %p1276_p13  ;;  %s1281_s18 = int_to_ptr.vmem [resolvable:$true] %s224_s18 }
  0x16   : > { %s1072_s29 = scalar_lea.hbm %s1522_s0, 768  ;;  %p1073_p7 = scmp.lt.u32.totalorder %s1274_s15, %s1522_s0 }
  0x17   : > { %p1070_p4 = pnand %p1069_p3, %p1068_p2  ;;  %p1074_p8 = scmp.lt.u32.totalorder %s1072_s29, %s1067_s20 }
  0x18   : > { %p1076_p9 = scmp.lt.u32.totalorder %s1067_s20, %s1274_s15 }
  0x19   : > { %p1071_p5 = pneg %p1070_p4  ;;  %p1075_p10 = por %p1074_p8, %p1073_p7 }
  0x1b   : > { %p1077_p0 = por %p1076_p9, %p1075_p10 }
  0x1d   : > { %p1078_p1 = pnand %p1077_p0, %p1071_p5 }
  0x1f   : > { %1081 = shalt.err (!%p1078_p1)
}
  0x20   : > { %s1082_s10 = scalar_lea.vmem %s1281_s18, 384  ;;  %s1165_s12 = smov [#allocation2]  }
  0x21   : > { %p1083_p2 = scmp.ne.s32.totalorder %s1281_s18, %s1082_s10  ;;  %s1087_s14 = sshll.u32 %s1165_s12, 4  ;;  %s1088_s14 = int_to_ptr.vmem [resolvable:$false] %s1087_s14 }
  0x22   : > { %s1089_s17 = scalar_lea.vmem %s1088_s14, 768  ;;  %p1090_p11 = scmp.lt.s32.totalorder %s1281_s18, %s1088_s14 }
  0x23   : > { %p1085_p4 = pnand %p1083_p2, %p1069_p3  ;;  %p1091_p7 = scmp.lt.s32.totalorder %s1089_s17, %s1082_s10 }
  0x25   : > { %p1086_p12 = pneg %p1085_p4  ;;  %p1092_p8 = por %p1091_p7, %p1090_p11 }
  0x27   : > { %p1093_p9 = pnand %p1092_p8, %p1086_p12 }
  0x29   : > { %1096 = shalt.err (!%p1093_p9)
}
  0x2a   : > { %929 = dma.hbm_to_vmem [thread:$0]  (!%p1276_p13), %s1274_s15, 384, %s1281_s18, %s213_s19  }
  0x2b   : > { %p1534_p0 = scmp.lt.s32.totalorder %s1163_s24, 3  ;;  %p1535_p1 = scmp.ge.s32.totalorder %s1163_s24, 1 }
  0x2d   : > { %p230_p3 = pnand %p1535_p1, %p1534_p0 }
  0x2e   : > { %s1314_s20 = sand.u32 (!%p230_p3), 1, %s1155_s22  }
  0x2f   : > { %233 = sbr.rel (%p230_p3) target bundleno = 1173 (0x495), region = 44  ;;  %s236_s28 = scalar_lea.sflag (!%p230_p3), [#allocation3], %s1314_s20 }
  0x30   : > { %s920_s26 = smul.u32 (!%p230_p3), 24, %s1314_s20 }
  0x32   : > { %s239_s16 = scalar_lea.vmem (!%p230_p3), [#allocation2], %s920_s26 }
  0x36   : > { %1142 = dma.done.wait (%p1254_p6), %s236_s28, 384  }
  0x37   : > { %1144 = vsyncadd (%p1254_p6), %s236_s28, 4294966912  ;;  %v1166_v0 = vmov 0.0   ;;  %v1325_v1 = vld [vmem:[%s239_s16 + $0x8] sm:$0xff]  ;;  %v1327_v2 = vld [vmem:[%s239_s16 + $0x10] sm:$0xff]  ;;  %s1167_s15 = smov 126   ;;  %s1168_s18 = smov 127  }
  0x38   : > { %890 = vmatprep.subr.bf16.mxu1 %v1166_v0  ;;  %v986_v3 = vpack.i.bf16 %v1327_v2, %v1325_v1  ;;  %v1333_v4 = vld [vmem:[%s239_s16] sm:$0xff]  ;;  %s1169_s7 = smov 110   ;;  %s1170_s19 = smov 108   ;;  %vm1174_vm0 = vmmov 0   ;;  %v1175_v5 = vmov 0   ;;  %vm282_vm1 = vcmask 1039360  }
  0x39   : > { %s1171_s29 = smov 109   ;;  %s1172_s11 = smov 91   ;;  %900 = vmatprep.mubr.msk.bf16.mxu1 %vm1174_vm0, %v1166_v0  ;;  %440 = vmatprep.mubr.bf16.mxu0 %v1175_v5  ;;  %v1016_v6 = vpack.i.bf16 %v1325_v1, %v1333_v4  ;;  %v388_v7 = vld [vmem:[%s1525_s3] sm:$0xff]  ;;  %vm306_vm2 = vcmask 900096   ;;  %vm294_vm3 = vcmask 1031168   ;;  %vm330_vm4 = vcmask 883712  }
  0x3a   : > { %987 = vrot.lane.b32.xlu1 %v986_v3, %s1167_s15  ;;  %982 = vrot.lane.b32.xlu0 %v986_v3, %s1168_s18  ;;  %s1173_s13 = smov 92   ;;  %s1176_s10 = smov 90   ;;  %vm318_vm5 = vcmask 891904   ;;  %vm354_vm6 = vcmask 744448   ;;  %vm342_vm7 = vcmask 752640   ;;  %vm366_vm8 = vcmask 736256  }
  0x3b   : > { %1021 = vset.pattern.permute.xlu0 %v1175_v5  ;;  %vm398_vm9 = vcmask 1043456   ;;  %vm394_vm10 = vcmask 588800   ;;  %s1177_s14 = smov 19   ;;  %vm520_vm11 = vcmask 154624   ;;  %vm527_vm12 = vcmask 711680   ;;  %p1536_p11 = scmp.ne.s32.totalorder %s1531_s8, 0 }
  0x3c   : > { %vm865_vm13 = vmneg %vm520_vm11  ;;  %vm1178_vm14 = vmmov 1  }
  0x3d   : > { %vm871_vm15 = vmpackc.low %vm1178_vm14, %vm527_vm12 }
  0x3e   : > { %992 = vrot.lane.b32.xlu1 %v986_v3, %s1169_s7  ;;  %276 = vrot.lane.b32.xlu0 %v1333_v4, %s1168_s18 }
  0x42   : > { %300 = vrot.lane.b32.xlu1 %v1333_v4, %s1169_s7  ;;  %288 = vrot.lane.b32.xlu0 %v1333_v4, %s1167_s15 }
  0x46   : > { %1002 = vrot.lane.b32.xlu1 %v986_v3, %s1170_s19  ;;  %997 = vrot.lane.b32.xlu0 %v986_v3, %s1171_s29 }
  0x4a   : > { %324 = vrot.lane.b32.xlu1 %v1333_v4, %s1170_s19  ;;  %312 = vrot.lane.b32.xlu0 %v1333_v4, %s1171_s29 }
  0x4e   : > { %1012 = vrot.lane.b32.xlu1 %v986_v3, %s1172_s11  ;;  %1007 = vrot.lane.b32.xlu0 %v986_v3, %s1173_s13 }
  0x52   : > { %348 = vrot.lane.b32.xlu1 %v1333_v4, %s1172_s11  ;;  %336 = vrot.lane.b32.xlu0 %v1333_v4, %s1173_s13 }
  0x56   : > { %1017 = vrot.lane.b32.xlu0 %v1016_v6, %s1176_s10  ;;  %364 = vrot.lane.b32.xlu1 %v1327_v2, %s1176_s10 }
  0x5a   : > { %391 = vperm.xlu0 %1021, %v388_v7  }
  0xac   : > { %v988_v8 = vpop.permute.xlu1 %987  ;;  %v983_v9 = vpop.permute.xlu0 %982 }
  0xad   : > { %v985_v10 = vunpack.i.h.bf16 %v983_v9  ;;  %v984_v11 = vunpack.i.l.bf16 %v983_v9  ;;  %v990_v12 = vunpack.i.h.bf16 %v988_v8  ;;  %v989_v13 = vunpack.i.l.bf16 %v988_v8 }
  0xaf   : > { %v375_v14 = vpack.c.bf16 %v985_v10, %v1327_v2  ;;  %v284_v15 = vsel %vm282_vm1, %v984_v11, %v985_v10  ;;  %v296_v24 = vsel %vm294_vm3, %v989_v13, %v990_v12 }
  0xb0   : > { %v993_v16 = vpop.permute.xlu1 %992  ;;  %v277_v17 = vpop.permute.xlu0 %276  ;;  %v374_v18 = vpack.c.bf16 %v284_v15, %v1325_v1  ;;  %v493_v15 = vlaneseq }
  0xb1   : > { %v995_v19 = vunpack.i.h.bf16 %v993_v16  ;;  %v994_v20 = vunpack.i.l.bf16 %v993_v16  ;;  %v283_v21 = vsel %vm282_vm1, %v277_v17, %v984_v11  ;;  %891 = vmatpush3.bf16.msra.mxu1 %v375_v14 }
  0xb2   : > { %408 = vmatprep.subr.bf16.mxu0 %v374_v18  ;;  %892 = vmatprep.subr.bf16.mxu1 %v1166_v0  ;;  %v373_v22 = vpack.c.bf16 %v283_v21, %v1333_v4  ;;  %v494_v16 = vshrl.u32 %v493_v15, 7 }
  0xb3   : > { %v378_v23 = vpack.c.bf16 %v995_v19, %v990_v12  ;;  %v308_v25 = vsel %vm306_vm2, %v994_v20, %v995_v19 }
  0xb4   : > { %v301_v26 = vpop.permute.xlu1 %300  ;;  %409 = vmatpush1.bf16.msra.mxu0 %v373_v22  ;;  %v289_v27 = vpop.permute.xlu0 %288  ;;  %v377_v28 = vpack.c.bf16 %v308_v25, %v296_v24  ;;  %v503_v18 = vsub.s32 2, %v494_v16 }
  0xb5   : > { %v307_v29 = vsel %vm306_vm2, %v301_v26, %v994_v20  ;;  %v295_v30 = vsel %vm294_vm3, %v289_v27, %v989_v13  ;;  %893 = vmatpush3.bf16.msra.mxu1 %v378_v23  ;;  %v372_v13 = vld [vmem:[%s1524_s2] sm:$0xf]  ;;  %v499_v23 = vsub.s32 1, %v494_v16 }
  0xb6   : > { %v376_v31 = vpack.c.bf16 %v307_v29, %v295_v30  ;;  %410 = vmatprep.subr.bf16.mxu0 %v377_v28  ;;  %894 = vmatprep.subr.bf16.mxu1 %v1166_v0  ;;  %v272_v20 = vld [vmem:[%s1523_s1] sm:$0x7] }
  0xb7   : > { %v504_v28 = vrot.slane %v272_v20, %v503_v18 }
  0xb8   : > { %v1003_v32 = vpop.permute.xlu1 %1002  ;;  %411 = vmatpush1.bf16.msra.mxu0 %v376_v31  ;;  %v998_v33 = vpop.permute.xlu0 %997 }
  0xb9   : > { %v1005_v34 = vunpack.i.h.bf16 %v1003_v32  ;;  %v1004_v35 = vunpack.i.l.bf16 %v1003_v32  ;;  %v1000_v36 = vunpack.i.h.bf16 %v998_v33  ;;  %v999_v37 = vunpack.i.l.bf16 %v998_v33 }
  0xbb   : > { %v381_v38 = vpack.c.bf16 %v1005_v34, %v1000_v36  ;;  %v320_v39 = vsel %vm318_vm5, %v999_v37, %v1000_v36  ;;  %v332_v40 = vsel %vm330_vm4, %v1004_v35, %v1005_v34  ;;  %v495_v34 = vsub.s32 0, %v494_v16 }
  0xbc   : > { %v325_v41 = vpop.permute.xlu1 %324  ;;  %v313_v42 = vpop.permute.xlu0 %312  ;;  %v380_v43 = vpack.c.bf16 %v332_v40, %v320_v39 }
  0xbd   : > { %v331_v44 = vsel %vm330_vm4, %v325_v41, %v1004_v35  ;;  %v319_v45 = vsel %vm318_vm5, %v313_v42, %v999_v37  ;;  %895 = vmatpush3.bf16.msra.mxu1 %v381_v38  ;;  %v496_v39 = vrot.slane %v272_v20, %v495_v34 }
  0xbe   : > { %v379_v46 = vpack.c.bf16 %v331_v44, %v319_v45  ;;  %412 = vmatprep.subr.bf16.mxu0 %v380_v43  ;;  %896 = vmatprep.subr.bf16.mxu1 %v1166_v0 }
  0xc0   : > { %v1013_v47 = vpop.permute.xlu1 %1012  ;;  %v1008_v48 = vpop.permute.xlu0 %1007  ;;  %413 = vmatpush1.bf16.msra.mxu0 %v379_v46 }
  0xc1   : > { %v1015_v49 = vunpack.i.h.bf16 %v1013_v47  ;;  %v1014_v50 = vunpack.i.l.bf16 %v1013_v47  ;;  %v1010_v51 = vunpack.i.h.bf16 %v1008_v48  ;;  %v1009_v52 = vunpack.i.l.bf16 %v1008_v48 }
  0xc3   : > { %v384_v53 = vpack.c.bf16 %v1015_v49, %v1010_v51  ;;  %v344_v54 = vsel %vm342_vm7, %v1009_v52, %v1010_v51  ;;  %v356_v55 = vsel %vm354_vm6, %v1014_v50, %v1015_v49 }
  0xc4   : > { %v349_v56 = vpop.permute.xlu1 %348  ;;  %v337_v57 = vpop.permute.xlu0 %336  ;;  %v383_v58 = vpack.c.bf16 %v356_v55, %v344_v54 }
  0xc5   : > { %v355_v59 = vsel %vm354_vm6, %v349_v56, %v1014_v50  ;;  %v343_v60 = vsel %vm342_vm7, %v337_v57, %v1009_v52  ;;  %897 = vmatpush3.bf16.msra.mxu1 %v384_v53  ;;  %v635_v52 = vld [vmem:[%s1527_s5] sm:$0xff] }
  0xc6   : > { %v382_v61 = vpack.c.bf16 %v355_v59, %v343_v60  ;;  %414 = vmatprep.subr.bf16.mxu0 %v383_v58  ;;  %898 = vmatprep.subr.bf16.mxu1 %v1166_v0 }
  0xc8   : > { %v1018_v62 = vpop.permute.xlu0 %1017  ;;  %415 = vmatpush1.bf16.msra.mxu0 %v382_v61  ;;  %v365_v63 = vpop.permute.xlu1 %364 }
  0xc9   : > { %v1020_v3 = vunpack.i.h.bf16 %v1018_v62  ;;  %v1019_v6 = vunpack.i.l.bf16 %v1018_v62  ;;  %v387_v7 = vpack.c.bf16 %v365_v63, %v365_v63 }
  0xcb   : > { %v368_v8 = vsel %vm366_vm8, %v1020_v3, %v365_v63  ;;  %v406_v9 = vsel %vm398_vm9, %v387_v7, 0  ;;  %v367_v10 = vsel %vm366_vm8, %v1019_v6, %v1020_v3 }
  0xcc   : > { %v386_v11 = vpack.c.bf16 %v368_v8, %v368_v8  ;;  %899 = vmatpush3.bf16.msra.mxu1 %v406_v9  ;;  %v385_v12 = vpack.c.bf16 %v367_v10, %v367_v10 }
  0xcd   : > { %904 = vmatprep.subr.bf16.mxu1 %v1166_v0 }
  0xce   : > { %862 = vmatprep.subr.msk.bf16.mxu0 %vm398_vm9, %v386_v11  ;;  %v400_v14 = vsel %vm398_vm9, %v385_v12, 0 }
  0xcf   : > { %417 = vmatpush1.bf16.msra.mxu0 %v400_v14  ;;  %901 = vmatmul.mubr.msk.bf16.vlgmr.msra.gmra.mrb[0].mxu1 %vm394_vm10, %v372_v13 }
  0xd0   : > { %914 = vmatprep.mubr.msk.bf16.mxu1 %vm1174_vm0, %v1166_v0  ;;  %vm866_vm0 = vmpackc.low %vm1178_vm14, %vm865_vm13 }
  0xd2   : > { %863 = vmatmul.mubr.msk.bf16.vlgmr.msra.gmra.mrb[0].mxu0 %vm394_vm10, %v372_v13 }
  0xd3   : > { %685 = vmatprep.mubr.bf16.mxu0 %v1175_v5  ;;  %v500_v5 = vrot.slane %v272_v20, %v499_v23 }
  0xd9   : > { %v392_v17 = vpop.permute.xlu0 %391 }
 0x1a2   : > { %v483_v19 = vpop.f32.mrb[0].mxu1 }
 0x1a3   : > { %v902_v21 = vpop.f32.mrb[1].mxu1  ;;  %v484_v22 = vadd.f32 %v483_v19, %v392_v17 }
 0x1a4   : > { %v486_v24 = vpop.f32.mrb[2].mxu1 }
 0x1a5   : > { %v491_v25 = vmax.f32 %v484_v22, 0.0  ;;  %v442_v26 = vpop.f32.mrb[0].mxu0  ;;  %v903_v27 = vpop.f32.mrb[3].mxu1 }
 0x1a6   : > { %v444_v29 = vpop.f32.mrb[1].mxu0  ;;  %v443_v33 = vadd.f32 %v442_v26, %v392_v17 }
 0x1a7   : > { %v445_v30 = vadd.f32 %v444_v29, %v392_v17  ;;  %v446_v31 = vpop.f32.mrb[2].mxu0  ;;  %v510_v36 = vmul.f32 %v504_v28, %v491_v25 }
 0x1a8   : > { %v447_v32 = vpop.f32.mrb[3].mxu0  ;;  %v489_v38 = vmax.f32 %v443_v33, 0.0 }
 0x1a9   : > { %v490_v35 = vmax.f32 %v445_v30, 0.0 }
 0x1aa   : > { %v508_v41 = vmul.f32 %v496_v39, %v489_v38 }
 0x1ab   : > { %v509_v37 = vmul.f32 %v500_v5, %v490_v35 }
 0x1ad   : > { %v1022_v40 = vpack.i.bf16 %v510_v36, %v509_v37 }
 0x1af   : > { %1023 = vrot.lane.b32.xlu1 %v1022_v40, %s1177_s14 }
 0x1b3   : > { %514 = vrot.lane.b32.xlu1 %v508_v41, %s1177_s14 }
 0x221   : > { %v1024_v42 = vpop.permute.xlu1 %1023 }
 0x222   : > { %v1026_v45 = vunpack.i.h.bf16 %v1024_v42  ;;  %v1025_v46 = vunpack.i.l.bf16 %v1024_v42 }
 0x224   : > { %v522_v47 = vsel %vm520_vm11, %v1025_v46, %v1026_v45 }
 0x225   : > { %v515_v43 = vpop.permute.xlu1 %514  ;;  %v528_v48 = vsel %vm527_vm12, %v522_v47, 0.0 }
 0x226   : > { %v526_v44 = vsel %vm520_vm11, 0.0, %v515_v43  ;;  %v521_v49 = vsel %vm520_vm11, %v515_v43, %v1025_v46 }
 0x227   : > { %542 = vrot.lane.b32.xlu0 %v526_v44, %s1167_s15  ;;  %531 = vrot.lane.b32.xlu1 %v526_v44, %s1168_s18  ;;  %v1027_v50 = vpack.i.bf16 %v528_v48, %v521_v49  ;;  %v1057_v51 = vpack.i.bf16 %v521_v49, %v526_v44 }
 0x22b   : > { %564 = vrot.lane.b32.xlu0 %v526_v44, %s1171_s29  ;;  %553 = vrot.lane.b32.xlu1 %v526_v44, %s1169_s7 }
 0x22f   : > { %586 = vrot.lane.b32.xlu0 %v526_v44, %s1173_s13  ;;  %575 = vrot.lane.b32.xlu1 %v526_v44, %s1170_s19 }
 0x233   : > { %597 = vrot.lane.b32.xlu1 %v526_v44, %s1172_s11  ;;  %1028 = vrot.lane.b32.xlu0 %v1027_v50, %s1168_s18 }
 0x237   : > { %1038 = vrot.lane.b32.xlu1 %v1027_v50, %s1169_s7  ;;  %1033 = vrot.lane.b32.xlu0 %v1027_v50, %s1167_s15  ;;  %s921_s7 = smul.u32 384, %s1236_s25  ;;  %s773_s25 = scalar_lea.sflag [#allocation4], %s1314_s20 }
 0x239   : > { %s1477_s16 = scalar_lea.hbm %s1528_s6, %s921_s7 }
 0x23b   : > { %1048 = vrot.lane.b32.xlu1 %v1027_v50, %s1170_s19  ;;  %1043 = vrot.lane.b32.xlu0 %v1027_v50, %s1171_s29  ;;  %s267_s19 = scalar_lea.vmem [#allocation5], %s920_s26 }
 0x23f   : > { %1063 = vrot.lane.b32.xlu1 %v1027_v50, %s1172_s11  ;;  %1053 = vrot.lane.b32.xlu0 %v1027_v50, %s1173_s13  ;;  %s787_s11 = sshll.u32 %s267_s19, 4  ;;  %s1479_s11 = int_to_ptr.vmem [resolvable:$true] %s787_s11 }
 0x240   : > { %s1097_s26 = scalar_lea.vmem %s1479_s11, 384 }
 0x241   : > { %p1098_p6 = scmp.ne.s32.totalorder %s1479_s11, %s1097_s26 }
 0x243   : > { %612 = vrot.lane.b32.xlu1 %v528_v48, %s1176_s10  ;;  %1058 = vrot.lane.b32.xlu0 %v1057_v51, %s1176_s10  ;;  %p1099_p12 = pnand %p1098_p6, %p1536_p11 }
 0x245   : > { %p1100_p13 = pneg %p1099_p12 }
 0x247   : > { %638 = vperm.xlu0 %1021, %v635_v52  }
 0x299   : > { %v543_v53 = vpop.permute.xlu0 %542  ;;  %v532_v54 = vpop.permute.xlu1 %531 }
 0x29d   : > { %v565_v55 = vpop.permute.xlu0 %564  ;;  %v554_v56 = vpop.permute.xlu1 %553 }
 0x2a1   : > { %v587_v57 = vpop.permute.xlu0 %586  ;;  %v576_v58 = vpop.permute.xlu1 %575 }
 0x2a5   : > { %v598_v59 = vpop.permute.xlu1 %597  ;;  %v1029_v60 = vpop.permute.xlu0 %1028 }
 0x2a6   : > { %v1031_v61 = vunpack.i.h.bf16 %v1029_v60  ;;  %v1030_v62 = vunpack.i.l.bf16 %v1029_v60 }
 0x2a8   : > { %v872_v63 = vpack.c.bf16 %v1031_v61, %v522_v47  ;;  %v537_v3 = vsel %vm282_vm1, %v532_v54, %v1030_v62  ;;  %v538_v6 = vsel %vm282_vm1, %v1030_v62, %v1031_v61  ;;  %vm770_vm1 = vcmask 556032  }
 0x2a9   : > { %v867_v7 = vpack.c.bf16 %v537_v3, %v515_v43  ;;  %v1039_v8 = vpop.permute.xlu1 %1038  ;;  %v1034_v9 = vpop.permute.xlu0 %1033  ;;  %v621_v10 = vpack.c.bf16 %v538_v6, %v521_v49 }
 0x2aa   : > { %v1041_v11 = vunpack.i.h.bf16 %v1039_v8  ;;  %v1040_v12 = vunpack.i.l.bf16 %v1039_v8  ;;  %v1036_v13 = vunpack.i.h.bf16 %v1034_v9  ;;  %v1035_v14 = vunpack.i.l.bf16 %v1034_v9  ;;  %905 = vmatpush3.bf16.msk.msra.mxu1 %vm871_vm15, %v872_v63 }
 0x2ab   : > { %653 = vmatprep.subr.bf16.mxu0 %v621_v10  ;;  %906 = vmatprep.subr.bf16.mxu1 %v1166_v0 }
 0x2ac   : > { %v559_v15 = vsel %vm306_vm2, %v554_v56, %v1040_v12  ;;  %v625_v16 = vpack.c.bf16 %v1041_v11, %v1036_v13  ;;  %v548_v17 = vsel %vm294_vm3, %v543_v53, %v1035_v14  ;;  %868 = vmatpush1.bf16.msk.msra.mxu0 %vm866_vm0, %v867_v7  ;;  %v549_v18 = vsel %vm294_vm3, %v1035_v14, %v1036_v13 }
 0x2ad   : > { %v623_v19 = vpack.c.bf16 %v559_v15, %v548_v17  ;;  %v1049_v20 = vpop.permute.xlu1 %1048  ;;  %v1044_v21 = vpop.permute.xlu0 %1043  ;;  %v560_v22 = vsel %vm306_vm2, %v1040_v12, %v1041_v11 }
 0x2ae   : > { %v1051_v23 = vunpack.i.h.bf16 %v1049_v20  ;;  %v1050_v24 = vunpack.i.l.bf16 %v1049_v20  ;;  %v1046_v25 = vunpack.i.h.bf16 %v1044_v21  ;;  %v1045_v26 = vunpack.i.l.bf16 %v1044_v21  ;;  %907 = vmatpush3.bf16.msra.mxu1 %v625_v16 }
 0x2af   : > { %v624_v27 = vpack.c.bf16 %v560_v22, %v549_v18  ;;  %908 = vmatprep.subr.bf16.mxu1 %v1166_v0 }
 0x2b0   : > { %v581_v28 = vsel %vm330_vm4, %v576_v58, %v1050_v24  ;;  %v628_v29 = vpack.c.bf16 %v1051_v23, %v1046_v25  ;;  %v570_v30 = vsel %vm318_vm5, %v565_v55, %v1045_v26  ;;  %v571_v5 = vsel %vm318_vm5, %v1045_v26, %v1046_v25 }
 0x2b1   : > { %v626_v31 = vpack.c.bf16 %v581_v28, %v570_v30  ;;  %655 = vmatprep.subr.bf16.mxu0 %v624_v27  ;;  %v1064_v32 = vpop.permute.xlu1 %1063  ;;  %v1054_v33 = vpop.permute.xlu0 %1053  ;;  %v582_v34 = vsel %vm330_vm4, %v1050_v24, %v1051_v23 }
 0x2b2   : > { %656 = vmatpush1.bf16.msra.mxu0 %v623_v19  ;;  %v1066_v35 = vunpack.i.h.bf16 %v1064_v32  ;;  %v1065_v36 = vunpack.i.l.bf16 %v1064_v32  ;;  %v1056_v37 = vunpack.i.h.bf16 %v1054_v33  ;;  %v1055_v38 = vunpack.i.l.bf16 %v1054_v33  ;;  %909 = vmatpush3.bf16.msra.mxu1 %v628_v29 }
 0x2b3   : > { %v627_v39 = vpack.c.bf16 %v582_v34, %v571_v5  ;;  %910 = vmatprep.subr.bf16.mxu1 %v1166_v0 }
 0x2b4   : > { %v603_v40 = vsel %vm354_vm6, %v598_v59, %v1065_v36  ;;  %v631_v41 = vpack.c.bf16 %v1066_v35, %v1056_v37  ;;  %v592_v42 = vsel %vm342_vm7, %v587_v57, %v1055_v38  ;;  %v593_v43 = vsel %vm342_vm7, %v1055_v38, %v1056_v37  ;;  %v619_v57 = vld [vmem:[%s1526_s4] sm:$0xf] }
 0x2b5   : > { %v629_v44 = vpack.c.bf16 %v603_v40, %v592_v42  ;;  %657 = vmatprep.subr.bf16.mxu0 %v627_v39  ;;  %v613_v45 = vpop.permute.xlu1 %612  ;;  %v1059_v46 = vpop.permute.xlu0 %1058  ;;  %v604_v47 = vsel %vm354_vm6, %v1065_v36, %v1066_v35 }
 0x2b6   : > { %658 = vmatpush1.bf16.msra.mxu0 %v626_v31  ;;  %v634_v48 = vpack.c.bf16 %v613_v45, %v613_v45  ;;  %v1061_v49 = vunpack.i.h.bf16 %v1059_v46  ;;  %v1060_v50 = vunpack.i.l.bf16 %v1059_v46  ;;  %911 = vmatpush3.bf16.msra.mxu1 %v631_v41  ;;  %v630_v51 = vpack.c.bf16 %v604_v47, %v593_v43 }
 0x2b7   : > { %912 = vmatprep.subr.bf16.mxu1 %v1166_v0 }
 0x2b8   : > { %v615_v52 = vsel %vm366_vm8, %v1061_v49, %v613_v45  ;;  %659 = vmatprep.subr.bf16.mxu0 %v630_v51  ;;  %v651_v53 = vsel %vm398_vm9, %v634_v48, 0  ;;  %v614_v54 = vsel %vm366_vm8, %v1060_v50, %v1061_v49 }
 0x2b9   : > { %v633_v55 = vpack.c.bf16 %v615_v52, %v615_v52  ;;  %v632_v56 = vpack.c.bf16 %v614_v54, %v614_v54 }
 0x2ba   : > { %660 = vmatpush1.bf16.msra.mxu0 %v629_v44  ;;  %913 = vmatpush3.bf16.msra.mxu1 %v651_v53 }
 0x2bb   : > { %869 = vmatprep.subr.msk.bf16.mxu0 %vm398_vm9, %v633_v55  ;;  %v645_v58 = vsel %vm398_vm9, %v632_v56, 0 }
 0x2bd   : > { %915 = vmatmul.mubr.msk.bf16.vlgmr.msra.gmra.mrb[4].mxu1 %vm394_vm10, %v619_v57 }
 0x2be   : > { %662 = vmatpush1.bf16.msra.mxu0 %v645_v58 }
 0x2c1   : > { %870 = vmatmul.mubr.msk.bf16.vlgmr.msra.gmra.mrb[4].mxu0 %vm394_vm10, %v619_v57 }
 0x2c6   : > { %v639_v62 = vpop.permute.xlu0 %638 }
 0x390   : > { %v728_v0 = vpop.f32.mrb[4].mxu1 }
 0x391   : > { %v916_v59 = vpop.f32.mrb[5].mxu1  ;;  %v729_v9 = vadd.f32 %v728_v0, %v639_v62 }
 0x392   : > { %v731_v60 = vpop.f32.mrb[6].mxu1 }
 0x393   : > { %v917_v61 = vpop.f32.mrb[7].mxu1  ;;  %v736_v13 = vmul.f32 0.1, %v729_v9 }
 0x394   : > { %v687_v63 = vpop.f32.mrb[4].mxu0 }
 0x395   : > { %v688_v3 = vadd.f32 %v687_v63, %v639_v62  ;;  %v689_v6 = vpop.f32.mrb[5].mxu0 }
 0x396   : > { %v690_v7 = vadd.f32 %v689_v6, %v639_v62  ;;  %v691_v8 = vpop.f32.mrb[6].mxu0 }
 0x397   : > { %v734_v10 = vmul.f32 0.1, %v688_v3  ;;  %v692_v11 = vpop.f32.mrb[7].mxu0 }
 0x398   : > { %v735_v12 = vmul.f32 0.1, %v690_v7 }
 0x399   : > { %740 = vrot.lane.b32.xlu1 %v734_v10, %s1177_s14 }
 0x39a   : > { %742 = vrot.lane.b32.xlu0 %v735_v12, %s1177_s14 }
 0x39d   : > { %744 = vrot.lane.b32.xlu1 %v736_v13, %s1177_s14 }
 0x40b   : > { %v741_v14 = vpop.permute.xlu1 %740 }
 0x40c   : > { %v751_v15 = vadd.f32 %v741_v14, %v1333_v4  ;;  %v743_v16 = vpop.permute.xlu0 %742 }
 0x40d   : > { %v746_v17 = vsel %vm520_vm11, %v741_v14, %v743_v16 }
 0x40e   : > { %v752_v18 = vadd.f32 %v746_v17, %v1325_v1  ;;  %757 = vrot.lane.b32.xlu0 %v751_v15, %s1171_s29 }
 0x40f   : > { %v745_v19 = vpop.permute.xlu1 %744 }
 0x410   : > { %v747_v20 = vsel %vm520_vm11, %v743_v16, %v745_v19  ;;  %759 = vrot.lane.b32.xlu1 %v752_v18, %s1171_s29 }
 0x411   : > { %v753_v21 = vadd.f32 %v747_v20, %v1327_v2 }
 0x413   : > { %761 = vrot.lane.b32.xlu0 %v753_v21, %s1171_s29  ;;  %s1179_s29 = smov [#allocation5]  }
 0x414   : > { %s1101_s12 = sshll.u32 %s1179_s29, 4  ;;  %s1102_s12 = int_to_ptr.vmem [resolvable:$false] %s1101_s12 }
 0x415   : > { %s1103_s14 = scalar_lea.vmem %s1102_s12, 768  ;;  %p1104_p5 = scmp.lt.s32.totalorder %s1479_s11, %s1102_s12 }
 0x416   : > { %p1105_p10 = scmp.lt.s32.totalorder %s1103_s14, %s1097_s26 }
 0x418   : > { %p1106_p2 = por %p1105_p10, %p1104_p5 }
 0x41a   : > { %p1107_p4 = pnand %p1106_p2, %p1100_p13 }
 0x480   : > { %v758_v22 = vpop.permute.xlu0 %757 }
 0x482   : > { %v760_v4 = vpop.permute.xlu1 %759 }
 0x483   : > { %v763_v1 = vsel %vm318_vm5, %v758_v22, %v760_v4 }
 0x484   : > { %768 = vst [vmem:[%s267_s19] sm:$0xff] %v763_v1 }
 0x485   : > { %v762_v23 = vpop.permute.xlu0 %761 }
 0x486   : > { %v764_v2 = vsel %vm318_vm5, %v760_v4, %v762_v23  ;;  %771 = vst.msk [vmem:[%s267_s19 + $0x10] sm:$0xff] %vm770_vm1, %v762_v23 }
 0x487   : > { %769 = vst [vmem:[%s267_s19 + $0x8] sm:$0xff] %v764_v2 }
 0x488   : > { %1110 = shalt.err (!%p1107_p4)
}
 0x489   : > { %s1111_s20 = scalar_lea.hbm %s1477_s16, 384  ;;  %s1115_s15 = scalar_lea.hbm %s1528_s6, 768 }
 0x48a   : > { %p1112_p7 = scmp.ne.s32.totalorder %s1477_s16, %s1111_s20  ;;  %p1116_p0 = scmp.lt.u32.totalorder %s1477_s16, %s1528_s6 }
 0x48b   : > { %p1117_p1 = scmp.lt.u32.totalorder %s1115_s15, %s1111_s20  ;;  %p1119_p6 = scmp.lt.u32.totalorder %s1111_s20, %s1477_s16 }
 0x48c   : > { %p1113_p8 = pnand %p1112_p7, %p1536_p11 }
 0x48d   : > { %p1118_p3 = por %p1117_p1, %p1116_p0 }
 0x48e   : > { %p1114_p9 = pneg %p1113_p8 }
 0x48f   : > { %p1120_p12 = por %p1119_p6, %p1118_p3 }
 0x491   : > { %p1121_p13 = pnand %p1120_p12, %p1114_p9 }
 0x493   : > { %1124 = shalt.err (!%p1121_p13)
}
 0x494   : > { %924 = dma.vmem_to_hbm [thread:$0]  (%p1536_p11), %s1479_s11, 384, %s1477_s16, %s773_s25  }
 0x495 PF: > { %s799_s19 = sand.u32 1, %s1151_s21   ;;  %p1537_p5 = scmp.ne.s32.totalorder %s1532_s9, 0 }
 0x496   : > { %p1538_p10 = scmp.ge.s32.totalorder %s1163_s24, 2  ;;  %s800_s13 = scalar_lea.sflag [#allocation4], %s799_s19 }
 0x498   : > { %p931_p2 = pnand %p1538_p10, %p1537_p5 }
 0x49a   : > { %1146 = dma.done.wait (!%p931_p2), %s800_s13, 384  }
 0x49b   : > { %1148 = vsyncadd (!%p931_p2), %s800_s13, 4294966912  ;;  %p19_p4 = scmp.ge.s32.totalorder %s1240_s27, 4   ;;  %s1539_s21 = smov %s1155_s22 }
 0x49c   : > { %s1540_s22 = smov %s1159_s23  ;;  %s1541_s23 = smov %s1252_s30 }
 0x49d   : > { %s1542_s24 = smov %s1240_s27  ;;  %21 = sbr.rel (!%p19_p4) target bundleno = 5 (0x5), region = 89 }
 0x4a4   :  { %805 = vsyncpa [#allocation3], 1 }
 0x4a5   :  { %807 = vsyncpa [#allocation3 + $0x1], 1 }
 0x4a6   :  { %808 = vsyncpa [#allocation4], 1 }
 0x4a7   :  { %810 = vsyncpa [#allocation4 + $0x1], 1 }

</bundles_post_ra>
